<compile_context>
chip_gen: v7x
topology: tpu7x:2x2x1
jax: 0.10.0
libtpu: 0.0.40
codegen_flags: <defaults>
</compile_context>

<pallas_src>
import functools

import jax
import jax.numpy as jnp
from jax.experimental import pallas as pl
from jax.experimental.pallas import tpu as pltpu


# ----------------------------- helpers ------------------------------------ #

def _round_up(x, m):
    return ((x + m - 1) // m) * m


def _largest_divisor_tile(dim, target, align=128):
    """Largest multiple of `align` that divides `dim` (dim is a multiple of
    `align`) and is <= max(target, align)."""
    t = min(dim, max(align, (target // align) * align))
    while dim % t != 0:
        t -= align
    return t


def _vmem_capacity_bytes():
    """Best-effort per-core VMEM capacity (used only to size tiles)."""
    try:
        return int(pltpu.get_tpu_info().vmem_capacity_bytes)
    except Exception:
        pass
    try:
        if "v7" in jax.devices()[0].device_kind.lower():
            return 64 * 1024 * 1024
    except Exception:
        pass
    return 128 * 1024 * 1024


# ----------------------------- kernels ------------------------------------ #

def _pooler_kernel_fused_k(x_ref, w_ref, b_ref, o_ref):
    # Full contraction dim per step: no scratch accumulator, no predicates.
    # x_ref: (B_pad, Din_p)   w_ref: (Din_p, tn)   b_ref: (1, tn)   o_ref: (B_pad, tn)
    y = jnp.dot(x_ref[...], w_ref[...], preferred_element_type=jnp.float32)
    y = y + b_ref[...].astype(jnp.float32)
    o_ref[...] = jnp.tanh(y).astype(o_ref.dtype)


def _pooler_kernel_tiled_k(x_ref, w_ref, b_ref, o_ref, acc_ref, *, tk):
    # x_ref: (B_pad, Din_p) fully resident;  w_ref: (tk, tn) weight tile
    # acc_ref: (B_pad, tn) f32 accumulator, resident across the K axis.
    k = pl.program_id(1)

    @pl.when(k == 0)
    def _init():
        acc_ref[...] = jnp.zeros_like(acc_ref)

    kk = pl.multiple_of(k * tk, tk)
    acc_ref[...] += jnp.dot(x_ref[:, pl.ds(kk, tk)], w_ref[...],
                            preferred_element_type=jnp.float32)

    @pl.when(k == pl.num_programs(1) - 1)
    def _finalize():
        y = acc_ref[...] + b_ref[...].astype(jnp.float32)
        o_ref[...] = jnp.tanh(y).astype(o_ref.dtype)


# ----------------------------- wrappers ----------------------------------- #

def prepare_pooler_params(weight, bias, *, param_dtype=None):
    """One-time parameter prep — call OUTSIDE the per-step path and reuse.

    weight: [D_out, D_in] (PyTorch layout), bias: [D_out].
    Returns pre-transposed, 128-padded weight [Din_p, Dout_p] and f32 bias
    [1, Dout_p].  `param_dtype=jnp.bfloat16` halves weight HBM traffic
    (numerics decision left to the caller)."""
    weight = jnp.asarray(weight)
    bias = jnp.asarray(bias)
    d_out, d_in = weight.shape
    d_in_p, d_out_p = _round_up(d_in, 128), _round_up(d_out, 128)

    wt = weight.T                                       # [Din, Dout] — once
    if param_dtype is not None:
        wt = wt.astype(param_dtype)
    if (d_in_p, d_out_p) != (d_in, d_out):
        wt = jnp.pad(wt, ((0, d_in_p - d_in), (0, d_out_p - d_out)))

    b2d = bias.reshape(1, d_out).astype(jnp.float32)
    if d_out_p != d_out:
        b2d = jnp.pad(b2d, ((0, 0), (0, d_out_p - d_out)))

    return {"wt": wt, "b2d": b2d, "d_in": d_in, "d_out": d_out}


def pooler_forward(x, params, *, tn=None, tk=None):
    """x: [B, S, D_in]; params from `prepare_pooler_params`.
    Returns tanh(x[:, 0] @ W.T + b): [B, D_out] in x.dtype."""
    wt, b2d = params["wt"], params["b2d"]
    d_in, d_out = params["d_in"], params["d_out"]
    din_p, dout_p = wt.shape
    B = x.shape[0]
    assert x.shape[-1] == d_in

    # Activation prep (cheap: B x Din only; the D^2 weight is untouched here).
    x0 = x[:, 0, :]
    sublane = {4: 8, 2: 16, 1: 32}.get(jnp.dtype(x.dtype).itemsize, 8)
    b_pad = _round_up(max(B, 1), sublane)
    if (b_pad != B) or (din_p != d_in):
        x0 = jnp.pad(x0, ((0, b_pad - B), (0, din_p - d_in)))
    x0 = x0.astype(wt.dtype)

    # Per-generation tiling: the weight stream is the roofline.
    vmem_cap = _vmem_capacity_bytes()
    two_tensorcores = vmem_cap <= 64 * 1024 * 1024                 # v7x
    w_budget = (8 if two_tensorcores else 16) * 1024 * 1024        # per weight buffer
    vmem_limit = (48 if two_tensorcores else 96) * 1024 * 1024
    itemsize = jnp.dtype(wt.dtype).itemsize

    if tn is None:
        tn_target = min(dout_p,
                        max(128, (w_budget // (din_p * itemsize)) // 128 * 128))
        if two_tensorcores and dout_p >= 256:
            # Ensure >= 2 blocks on the "parallel" N axis so the weight stream
            # splits across v7x's two TensorCores.
            tn_target = min(tn_target, dout_p // 2)
        tn = _largest_divisor_tile(dout_p, tn_target)
    if tk is None:
        if din_p * tn * itemsize <= w_budget:
            tk = din_p                                             # collapse K
        else:
            tk = _largest_divisor_tile(
                din_p, max(128, (w_budget // (tn * itemsize)) // 128 * 128))

    n_n, n_k = dout_p // tn, din_p // tk
    out_shape = jax.ShapeDtypeStruct((b_pad, dout_p), x.dtype)

    if n_k == 1:
        # Single-pass kernel: no accumulator scratch, no pl.when.
        out = pl.pallas_call(
            _pooler_kernel_fused_k,
            out_shape=out_shape,
            grid_spec=pltpu.PrefetchScalarGridSpec(
                num_scalar_prefetch=0,
                grid=(n_n,),
                in_specs=[
                    pl.BlockSpec((b_pad, din_p), lambda j: (0, 0)),   # x0 resident
                    pl.BlockSpec((din_p, tn), lambda j: (0, j)),      # weight stream
                    pl.BlockSpec((1, tn), lambda j: (0, j)),          # bias
                ],
                out_specs=pl.BlockSpec((b_pad, tn), lambda j: (0, j)),
            ),
            compiler_params=pltpu.CompilerParams(
                dimension_semantics=("parallel",),
                vmem_limit_bytes=vmem_limit,
            ),
        )(x0, wt, b2d)
    else:
        kernel = functools.partial(_pooler_kernel_tiled_k, tk=tk)
        out = pl.pallas_call(
            kernel,
            out_shape=out_shape,
            grid_spec=pltpu.PrefetchScalarGridSpec(
                num_scalar_prefetch=0,
                grid=(n_n, n_k),                                # reduction last
                in_specs=[
                    pl.BlockSpec((b_pad, din_p), lambda j, k: (0, 0)),  # x0 resident
                    pl.BlockSpec((tk, tn), lambda j, k: (k, j)),        # weight tile
                    pl.BlockSpec((1, tn), lambda j, k: (0, j)),         # bias
                ],
                out_specs=pl.BlockSpec((b_pad, tn), lambda j, k: (0, j)),
                scratch_shapes=[pltpu.VMEM((b_pad, tn), jnp.float32)],
            ),
            compiler_params=pltpu.CompilerParams(
                dimension_semantics=("parallel", "arbitrary"),
                vmem_limit_bytes=vmem_limit,
            ),
        )(x0, wt, b2d)

    return out[:B, :d_out]


# ------------------------------- demo -------------------------------------- #

if __name__ == "__main__":
    key = jax.random.PRNGKey(0)
    k_x, k_w = jax.random.split(key)

    batch, seq, d_model = 2, 8, 256

    # Parameter init mirroring the module: weight ~ normal(0, 1), bias = 0.
    # x is scaled so tanh is not saturated and the numeric check is meaningful.
    x = 0.05 * jax.random.normal(k_x, (batch, seq, d_model), dtype=jnp.float32)
    weight = jax.random.normal(k_w, (d_model, d_model), dtype=jnp.float32)
    bias = jnp.zeros((d_model,), dtype=jnp.float32)

    params = prepare_pooler_params(weight, bias)      # hoisted one-time prep
    ref = jnp.tanh(x[:, 0, :] @ weight.T + bias)

    # 1) Auto-tiled path (K collapses at this size -> fused single-pass kernel).
    out = jax.block_until_ready(pooler_forward(x, params))
    assert out.shape == (batch, d_model)
    assert jnp.allclose(out, ref, atol=1e-4, rtol=1e-4), \
        float(jnp.max(jnp.abs(out - ref)))

    # 2) Forced small tiles -> exercises the K-accumulating kernel variant.
    out2 = jax.block_until_ready(pooler_forward(x, params, tn=128, tk=128))
    assert jnp.allclose(out2, ref, atol=1e-4, rtol=1e-4), \
        float(jnp.max(jnp.abs(out2 - ref)))

    print("KERNEL_OK")
</pallas_src>

<mosaic_0001>
module attributes {stable_mosaic.version = 11 : i64} {
  func.func @_pooler_kernel_fused_k(%arg0: i32, %arg1: memref<8x256xf32, #tpu.memory_space<vmem>>, %arg2: memref<256x256xf32, #tpu.memory_space<vmem>>, %arg3: memref<1x256xf32, #tpu.memory_space<vmem>>, %arg4: memref<8x256xf32, #tpu.memory_space<vmem>>) attributes {dimension_semantics = [#tpu.dimension_semantics<parallel>], iteration_bounds = array<i64: 1>, scalar_prefetch = 0 : i64, scratch_operands = 0 : i64, tpu.core_type = #tpu.core_type<tc>, window_params = [{pipeline_mode = #tpu.pipeline_mode<synchronous>, transform_indices = @transform_0, window_bounds = array<i64: 8, 256>}, {transform_indices = @transform_1, window_bounds = array<i64: 256, 256>}, {transform_indices = @transform_2, window_bounds = array<i64: 1, 256>}, {transform_indices = @transform_3, window_bounds = array<i64: 8, 256>}]} {
    %c0 = arith.constant 0 : index
    %c0_0 = arith.constant 0 : index
    %0 = vector.load %arg1[%c0, %c0_0] : memref<8x256xf32, #tpu.memory_space<vmem>>, vector<8x256xf32>
    %c0_1 = arith.constant 0 : index
    %c0_2 = arith.constant 0 : index
    %1 = vector.load %arg2[%c0_1, %c0_2] : memref<256x256xf32, #tpu.memory_space<vmem>>, vector<256x256xf32>
    %cst = arith.constant dense<0.000000e+00> : vector<8x256xf32>
    %2 = tpu.matmul %0, %1, %cst {dimension_numbers = #tpu.dot_dimension_numbers<[1], [0], [0], [1], [0, 0, 1, 1], [], []>} : vector<8x256xf32>, vector<256x256xf32>, vector<8x256xf32> -> vector<8x256xf32>
    %c0_3 = arith.constant 0 : index
    %c0_4 = arith.constant 0 : index
    %3 = vector.load %arg3[%c0_3, %c0_4] : memref<1x256xf32, #tpu.memory_space<vmem>>, vector<1x256xf32>
    %4 = vector.broadcast %3 : vector<1x256xf32> to vector<8x256xf32>
    %5 = arith.addf %2, %4 : vector<8x256xf32>
    %6 = math.tanh %5 : vector<8x256xf32>
    %c0_5 = arith.constant 0 : index
    %c0_6 = arith.constant 0 : index
    %7 = vector.load %arg4[%c0_5, %c0_6] : memref<8x256xf32, #tpu.memory_space<vmem>>, vector<8x256xf32>
    tpu.vector_store %arg4[%c0_5, %c0_6], %6 {strides = array<i32>} : memref<8x256xf32, #tpu.memory_space<vmem>>, vector<8x256xf32>,
    return
  }
  func.func @transform_0(%arg0: i32) -> (i32, i32) {
    %c0_i32 = arith.constant 0 : i32
    %c0_i32_0 = arith.constant 0 : i32
    %c0_i32_1 = arith.constant 0 : i32
    return %c0_i32, %c0_i32_0 : i32, i32
  }
  func.func @transform_1(%arg0: i32) -> (i32, i32) {
    %c0_i32 = arith.constant 0 : i32
    %c0_i32_0 = arith.constant 0 : i32
    return %c0_i32, %arg0 : i32, i32
  }
  func.func @transform_2(%arg0: i32) -> (i32, i32) {
    %c0_i32 = arith.constant 0 : i32
    %c0_i32_0 = arith.constant 0 : i32
    return %c0_i32, %arg0 : i32, i32
  }
  func.func @transform_3(%arg0: i32) -> (i32, i32) {
    %c0_i32 = arith.constant 0 : i32
    %c0_i32_0 = arith.constant 0 : i32
    return %c0_i32, %arg0 : i32, i32
  }
}

</mosaic_0001>

<bundles_post_ra>
// kernel: tpu_custom_call.1
= control target key start
LH: loop header
LB: loop body
LE: loop exit
PB: predicated region body
PF: predicated region fallthrough
CT: control target
= control target key end

     0   :  { %8 = vsyncpa [#allocation3], 0  ;;  %s463_s0 = inlined_call_operand.hbm [shape: f32[8,256], index: 0, kind: input, shape index: {}]   ;;  %s464_s1 = inlined_call_operand.hbm [shape: f32[256,256], index: 1, kind: input, shape index: {}]   ;;  %s465_s2 = inlined_call_operand.hbm [shape: f32[1,256], index: 2, kind: input, shape index: {}]   ;;  %s466_s3 = inlined_call_operand.hbm [shape: f32[8,256], index: 3, kind: output, shape index: {}]  }
   0x1   :  { %9 = vsyncpa [#allocation6], 0 }
   0x2   :  { %10 = vsyncpa [#allocation4], 0  ;;  %s389_s12 = smov [#allocation5]   ;;  %s295_s16 = scalar_lea.hbm %s464_s1, 8192 }
   0x3   :  { %s26_s13 = sshll.u32 %s389_s12, 4  ;;  %p296_p0 = scmp.ne.s32.totalorder %s464_s1, %s295_s16  ;;  %s27_s13 = int_to_ptr.vmem [resolvable:$true] %s26_s13 }
   0x4   :  { %p299_p1 = scmp.lt.u32.totalorder %s295_s16, %s464_s1 }
   0x6   :  { %p301_p2 = pnand %p299_p1, %p296_p0 }
   0x8   :  { %304 = shalt.err (!%p301_p2)
}
   0x9   :  { %s305_s21 = scalar_lea.vmem %s27_s13, 8192  ;;  %p310_p4 = scmp.lt.s32.totalorder %s27_s13, %s27_s13 }
   0xa   :  { %p306_p3 = scmp.ne.s32.totalorder %s27_s13, %s305_s21  ;;  %p311_p5 = scmp.lt.s32.totalorder %s305_s21, %s305_s21 }
   0xc   :  { %p312_p6 = por %p311_p5, %p310_p4 }
   0xe   :  { %p313_p7 = pnand %p312_p6, %p306_p3 }
  0x10   :  { %316 = shalt.err (!%p313_p7)
}
  0x11   :  { %s390_s22 = smov 256   ;;  %s391_s23 = smov 16  }
  0x12   :  { %32 = dma.hbm_to_vmem [thread:$0]  %s464_s1, 8192, %s27_s13, [#allocation6], %s390_s22, %s390_s22, %s391_s23  }
  0x13   :  { %s392_s26 = smov [#allocation2]   ;;  %s393_s28 = smov [#allocation7]  }
  0x14   :  { %s17_s27 = sshll.u32 %s392_s26, 4  ;;  %s39_s29 = sshll.u32 %s393_s28, 4  ;;  %s18_s27 = int_to_ptr.vmem [resolvable:$true] %s17_s27  ;;  %s40_s29 = int_to_ptr.vmem [resolvable:$true] %s39_s29 }
  0x15   :  { %s317_s5 = scalar_lea.hbm %s463_s0, 256 }
  0x16   :  { %p318_p8 = scmp.ne.s32.totalorder %s463_s0, %s317_s5  ;;  %p321_p9 = scmp.lt.u32.totalorder %s317_s5, %s463_s0 }
  0x18   :  { %p323_p10 = pnand %p321_p9, %p318_p8 }
  0x1a   :  { %326 = shalt.err (!%p323_p10)
}
  0x1b   :  { %s327_s1 = scalar_lea.vmem %s18_s27, 256  ;;  %p332_p12 = scmp.lt.s32.totalorder %s18_s27, %s18_s27 }
  0x1c   :  { %p328_p11 = scmp.ne.s32.totalorder %s18_s27, %s327_s1  ;;  %p333_p13 = scmp.lt.s32.totalorder %s327_s1, %s327_s1 }
  0x1e   :  { %p334_p0 = por %p333_p13, %p332_p12 }
  0x20   :  { %p335_p1 = pnand %p334_p0, %p328_p11 }
  0x22   :  { %338 = shalt.err (!%p335_p1)
}
  0x23   :  { %20 = dma.hbm_to_vmem [thread:$0]  %s463_s0, 256, %s18_s27, [#allocation3]  }
  0x24   :  { %s339_s14 = scalar_lea.hbm %s465_s2, 32 }
  0x25   :  { %p340_p2 = scmp.ne.s32.totalorder %s465_s2, %s339_s14  ;;  %p343_p3 = scmp.lt.u32.totalorder %s339_s14, %s465_s2 }
  0x27   :  { %p345_p4 = pnand %p343_p3, %p340_p2 }
  0x29   :  { %348 = shalt.err (!%p345_p4)
}
  0x2a   :  { %s349_s19 = scalar_lea.vmem %s40_s29, 32  ;;  %p354_p6 = scmp.lt.s32.totalorder %s40_s29, %s40_s29 }
  0x2b   :  { %p350_p5 = scmp.ne.s32.totalorder %s40_s29, %s349_s19  ;;  %p355_p7 = scmp.lt.s32.totalorder %s349_s19, %s349_s19 }
  0x2d   :  { %p356_p8 = por %p355_p7, %p354_p6 }
  0x2f   :  { %p357_p9 = pnand %p356_p8, %p350_p5 }
  0x31   :  { %360 = shalt.err (!%p357_p9)
}
  0x32   :  { %42 = dma.hbm_to_vmem [thread:$0]  %s465_s2, 32, %s40_s29, [#allocation6]  }
  0x33   :  { %383 = dma.done.wait [#allocation3], 256  }
  0x34   :  { %384 = vsyncadd [#allocation3], 4294967040 }
  0x35   :  { %385 = dma.done.wait [#allocation6], 8224  }
  0x36   :  { %386 = vsyncadd [#allocation6], 4294959072  ;;  %v55_v0 = vld [vmem:[#allocation5 + $0x8] sm:$0xff]  ;;  %v57_v1 = vld [vmem:[#allocation5 + $0x18] sm:$0xff]  ;;  %s394_s2 = smov [#allocation8]  }
  0x37   :  { %v54_v2 = vld [vmem:[#allocation5] sm:$0xff]  ;;  %v221_v3 = vpack.c.bf16 %v57_v1, %v55_v0  ;;  %v56_v4 = vld [vmem:[#allocation5 + $0x10] sm:$0xff]  ;;  %v59_v5 = vld [vmem:[#allocation5 + $0x28] sm:$0xff]  ;;  %s211_s21 = sshll.u32 %s394_s2, 4  ;;  %s212_s21 = int_to_ptr.vmem [resolvable:$true] %s211_s21 }
  0x38   :  { %v61_v6 = vld [vmem:[#allocation5 + $0x38] sm:$0xff]  ;;  %v223_v7 = vpack.c.bf16 %v56_v4, %v54_v2  ;;  %v58_v9 = vld [vmem:[#allocation5 + $0x20] sm:$0xff]  ;;  %v60_v10 = vld [vmem:[#allocation5 + $0x30] sm:$0xff]  ;;  %s361_s22 = scalar_lea.vmem %s212_s21, 256  ;;  %p366_p11 = scmp.lt.s32.totalorder %s212_s21, %s212_s21 }
  0x39   :  { %v225_v8 = vpack.c.bf16 %v61_v6, %v59_v5  ;;  %v63_v11 = vld [vmem:[#allocation5 + $0x48] sm:$0xff]  ;;  %222 = vmatprep.subr.bf16.mxu0 %v221_v3  ;;  %v65_v12 = vld [vmem:[#allocation5 + $0x58] sm:$0xff]  ;;  %v227_v13 = vpack.c.bf16 %v60_v10, %v58_v9  ;;  %v62_v15 = vld [vmem:[#allocation5 + $0x40] sm:$0xff]  ;;  %p362_p10 = scmp.ne.s32.totalorder %s212_s21, %s361_s22  ;;  %p367_p12 = scmp.lt.s32.totalorder %s361_s22, %s361_s22 }
  0x3a   :  { %224 = vmatpush1.bf16.msra.mxu0 %v223_v7  ;;  %v229_v14 = vpack.c.bf16 %v65_v12, %v63_v11  ;;  %v64_v16 = vld [vmem:[#allocation5 + $0x50] sm:$0xff]  ;;  %v67_v17 = vld [vmem:[#allocation5 + $0x68] sm:$0xff]  ;;  %v69_v18 = vld [vmem:[#allocation5 + $0x78] sm:$0xff] }
  0x3b   :  { %226 = vmatprep.subr.bf16.mxu0 %v225_v8  ;;  %v231_v19 = vpack.c.bf16 %v64_v16, %v62_v15  ;;  %v233_v20 = vpack.c.bf16 %v69_v18, %v67_v17  ;;  %v66_v21 = vld [vmem:[#allocation5 + $0x60] sm:$0xff]  ;;  %v68_v22 = vld [vmem:[#allocation5 + $0x70] sm:$0xff]  ;;  %v71_v23 = vld [vmem:[#allocation5 + $0x88] sm:$0xff]  ;;  %p368_p13 = por %p367_p12, %p366_p11 }
  0x3c   :  { %v73_v24 = vld [vmem:[#allocation5 + $0x98] sm:$0xff]  ;;  %v235_v25 = vpack.c.bf16 %v68_v22, %v66_v21  ;;  %v70_v27 = vld [vmem:[#allocation5 + $0x80] sm:$0xff]  ;;  %v72_v28 = vld [vmem:[#allocation5 + $0x90] sm:$0xff] }
  0x3d   :  { %v237_v26 = vpack.c.bf16 %v73_v24, %v71_v23  ;;  %v75_v29 = vld [vmem:[#allocation5 + $0xa8] sm:$0xff]  ;;  %v77_v30 = vld [vmem:[#allocation5 + $0xb8] sm:$0xff]  ;;  %v239_v31 = vpack.c.bf16 %v72_v28, %v70_v27  ;;  %v74_v33 = vld [vmem:[#allocation5 + $0xa0] sm:$0xff]  ;;  %p369_p0 = pnand %p368_p13, %p362_p10 }
  0x3e   :  { %228 = vmatpush1.bf16.msra.mxu0 %v227_v13  ;;  %v241_v32 = vpack.c.bf16 %v77_v30, %v75_v29  ;;  %v76_v34 = vld [vmem:[#allocation5 + $0xb0] sm:$0xff]  ;;  %v79_v35 = vld [vmem:[#allocation5 + $0xc8] sm:$0xff]  ;;  %v81_v36 = vld [vmem:[#allocation5 + $0xd8] sm:$0xff] }
  0x3f   :  { %230 = vmatprep.subr.bf16.mxu0 %v229_v14  ;;  %v243_v37 = vpack.c.bf16 %v76_v34, %v74_v33  ;;  %v245_v38 = vpack.c.bf16 %v81_v36, %v79_v35  ;;  %v78_v39 = vld [vmem:[#allocation5 + $0xc0] sm:$0xff]  ;;  %v80_v40 = vld [vmem:[#allocation5 + $0xd0] sm:$0xff]  ;;  %v53_v41 = vld [vmem:[#allocation2 + $0x8] sm:$0xff]  ;;  %v120_v34 = vlaneseq }
  0x40   :  { %v83_v42 = vld [vmem:[#allocation5 + $0xe8] sm:$0xff]  ;;  %v85_v43 = vld [vmem:[#allocation5 + $0xf8] sm:$0xff]  ;;  %194 = vmatprep.mubr.f32.mxu0 %v53_v41  ;;  %v247_v44 = vpack.c.bf16 %v80_v40, %v78_v39  ;;  %v82_v46 = vld [vmem:[#allocation5 + $0xe0] sm:$0xff] }
  0x41   :  { %v249_v45 = vpack.c.bf16 %v85_v43, %v83_v42  ;;  %v84_v47 = vld [vmem:[#allocation5 + $0xf0] sm:$0xff]  ;;  %v87_v48 = vld [vmem:[#allocation5 + $0x108] sm:$0xff]  ;;  %v89_v49 = vld [vmem:[#allocation5 + $0x118] sm:$0xff]  ;;  %v121_v35 = vshrl.u32 %v120_v34, 7 }
  0x42   :  { %232 = vmatpush1.bf16.msra.mxu0 %v231_v19  ;;  %v251_v50 = vpack.c.bf16 %v84_v47, %v82_v46  ;;  %v253_v51 = vpack.c.bf16 %v89_v49, %v87_v48  ;;  %v86_v52 = vld [vmem:[#allocation5 + $0x100] sm:$0xff]  ;;  %v88_v53 = vld [vmem:[#allocation5 + $0x110] sm:$0xff]  ;;  %v91_v54 = vld [vmem:[#allocation5 + $0x128] sm:$0xff] }
  0x43   :  { %234 = vmatprep.subr.bf16.mxu0 %v233_v20  ;;  %v93_v55 = vld [vmem:[#allocation5 + $0x138] sm:$0xff]  ;;  %v255_v56 = vpack.c.bf16 %v88_v53, %v86_v52  ;;  %v90_v58 = vld [vmem:[#allocation5 + $0x120] sm:$0xff]  ;;  %v92_v59 = vld [vmem:[#allocation5 + $0x130] sm:$0xff]  ;;  %v122_v36 = vsub.s32 0, %v121_v35 }
  0x44   :  { %v257_v57 = vpack.c.bf16 %v93_v55, %v91_v54  ;;  %v95_v60 = vld [vmem:[#allocation5 + $0x148] sm:$0xff]  ;;  %v97_v61 = vld [vmem:[#allocation5 + $0x158] sm:$0xff]  ;;  %v259_v62 = vpack.c.bf16 %v92_v59, %v90_v58  ;;  %v94_v0 = vld [vmem:[#allocation5 + $0x140] sm:$0xff] }
  0x45   :  { %v261_v63 = vpack.c.bf16 %v97_v61, %v95_v60  ;;  %v96_v1 = vld [vmem:[#allocation5 + $0x150] sm:$0xff]  ;;  %v99_v2 = vld [vmem:[#allocation5 + $0x168] sm:$0xff]  ;;  %v101_v3 = vld [vmem:[#allocation5 + $0x178] sm:$0xff] }
  0x46   :  { %236 = vmatpush1.bf16.msra.mxu0 %v235_v25  ;;  %v263_v4 = vpack.c.bf16 %v96_v1, %v94_v0  ;;  %v265_v5 = vpack.c.bf16 %v101_v3, %v99_v2  ;;  %v98_v6 = vld [vmem:[#allocation5 + $0x160] sm:$0xff]  ;;  %v100_v7 = vld [vmem:[#allocation5 + $0x170] sm:$0xff]  ;;  %v103_v8 = vld [vmem:[#allocation5 + $0x188] sm:$0xff] }
  0x47   :  { %238 = vmatprep.subr.bf16.mxu0 %v237_v26  ;;  %v105_v9 = vld [vmem:[#allocation5 + $0x198] sm:$0xff]  ;;  %v267_v10 = vpack.c.bf16 %v100_v7, %v98_v6  ;;  %v102_v12 = vld [vmem:[#allocation5 + $0x180] sm:$0xff]  ;;  %v104_v13 = vld [vmem:[#allocation5 + $0x190] sm:$0xff] }
  0x48   :  { %v269_v11 = vpack.c.bf16 %v105_v9, %v103_v8  ;;  %v107_v14 = vld [vmem:[#allocation5 + $0x1a8] sm:$0xff]  ;;  %v109_v15 = vld [vmem:[#allocation5 + $0x1b8] sm:$0xff]  ;;  %v271_v16 = vpack.c.bf16 %v104_v13, %v102_v12  ;;  %v106_v18 = vld [vmem:[#allocation5 + $0x1a0] sm:$0xff] }
  0x49   :  { %v273_v17 = vpack.c.bf16 %v109_v15, %v107_v14  ;;  %v108_v19 = vld [vmem:[#allocation5 + $0x1b0] sm:$0xff]  ;;  %v111_v20 = vld [vmem:[#allocation5 + $0x1c8] sm:$0xff]  ;;  %v113_v21 = vld [vmem:[#allocation5 + $0x1d8] sm:$0xff] }
  0x4a   :  { %240 = vmatpush1.bf16.msra.mxu0 %v239_v31  ;;  %v275_v22 = vpack.c.bf16 %v108_v19, %v106_v18  ;;  %v277_v23 = vpack.c.bf16 %v113_v21, %v111_v20  ;;  %v110_v24 = vld [vmem:[#allocation5 + $0x1c0] sm:$0xff]  ;;  %v112_v25 = vld [vmem:[#allocation5 + $0x1d0] sm:$0xff]  ;;  %v115_v26 = vld [vmem:[#allocation5 + $0x1e8] sm:$0xff] }
  0x4b   :  { %242 = vmatprep.subr.bf16.mxu0 %v241_v32  ;;  %v117_v27 = vld [vmem:[#allocation5 + $0x1f8] sm:$0xff]  ;;  %v279_v28 = vpack.c.bf16 %v112_v25, %v110_v24  ;;  %v114_v30 = vld [vmem:[#allocation5 + $0x1e0] sm:$0xff]  ;;  %v116_v31 = vld [vmem:[#allocation5 + $0x1f0] sm:$0xff] }
  0x4c   :  { %v281_v29 = vpack.c.bf16 %v117_v27, %v115_v26  ;;  %v283_v32 = vpack.c.bf16 %v116_v31, %v114_v30  ;;  %v52_v33 = vld [vmem:[#allocation2] sm:$0xff] }
  0x4e   :  { %244 = vmatpush1.bf16.msra.mxu0 %v243_v37  ;;  %v118_v37 = vld [vmem:[#allocation7] sm:$0x3] }
  0x4f   :  { %246 = vmatprep.subr.bf16.mxu0 %v245_v38  ;;  %v126_v38 = vsub.s32 1, %v121_v35  ;;  %v123_v39 = vrot.slane %v118_v37, %v122_v36 }
  0x51   :  { %v127_v40 = vrot.slane %v118_v37, %v126_v38 }
  0x52   :  { %248 = vmatpush1.bf16.msra.mxu0 %v247_v44 }
  0x53   :  { %250 = vmatprep.subr.bf16.mxu0 %v249_v45 }
  0x56   :  { %252 = vmatpush1.bf16.msra.mxu0 %v251_v50 }
  0x57   :  { %254 = vmatprep.subr.bf16.mxu0 %v253_v51 }
  0x5a   :  { %256 = vmatpush1.bf16.msra.mxu0 %v255_v56 }
  0x5b   :  { %258 = vmatprep.subr.bf16.mxu0 %v257_v57 }
  0x5e   :  { %260 = vmatpush1.bf16.msra.mxu0 %v259_v62 }
  0x5f   :  { %262 = vmatprep.subr.bf16.mxu0 %v261_v63 }
  0x62   :  { %264 = vmatpush1.bf16.msra.mxu0 %v263_v4 }
  0x63   :  { %266 = vmatprep.subr.bf16.mxu0 %v265_v5 }
  0x66   :  { %268 = vmatpush1.bf16.msra.mxu0 %v267_v10 }
  0x67   :  { %270 = vmatprep.subr.bf16.mxu0 %v269_v11 }
  0x6a   :  { %272 = vmatpush1.bf16.msra.mxu0 %v271_v16 }
  0x6b   :  { %274 = vmatprep.subr.bf16.mxu0 %v273_v17 }
  0x6e   :  { %276 = vmatpush1.bf16.msra.mxu0 %v275_v22 }
  0x6f   :  { %278 = vmatprep.subr.bf16.mxu0 %v277_v23 }
  0x72   :  { %280 = vmatpush1.bf16.msra.mxu0 %v279_v28 }
  0x73   :  { %282 = vmatprep.subr.bf16.mxu0 %v281_v29 }
  0x76   :  { %284 = vmatpush1.bf16.msra.mxu0 %v283_v32 }
  0x79   :  { %195 = vmatmul.mubr.f32.vlgmr.msra.gmra.mrb[0].mxu0 %v52_v33 }
 0x14c   :  { %v196_v41 = vpop.f32.mrb[0].mxu0 }
 0x14d   :  { %v197_v42 = vadd.f32 %v196_v41, %v123_v39  ;;  %v198_v43 = vpop.f32.mrb[1].mxu0 }
 0x14e   :  { %v199_v44 = vadd.f32 %v198_v43, %v127_v40 }
 0x14f   :  { %291 = vtanh.f32 %v197_v42 }
 0x150   :  { %293 = vtanh.f32 %v199_v44 }
 0x159   :  { %v292_v45 = vpop.eup %291 }
 0x15a   :  { %v294_v46 = vpop.eup %293  ;;  %203 = vst [vmem:[#allocation8] sm:$0xff] %v292_v45 }
 0x15b   :  { %204 = vst [vmem:[#allocation8 + $0x8] sm:$0xff] %v294_v46 }
 0x15c   :  { %372 = shalt.err (!%p369_p0)
}
 0x15d   :  { %s373_s25 = scalar_lea.hbm %s466_s3, 256 }
 0x15e   :  { %p374_p1 = scmp.ne.s32.totalorder %s466_s3, %s373_s25  ;;  %p377_p2 = scmp.lt.u32.totalorder %s373_s25, %s466_s3 }
 0x160   :  { %p379_p3 = pnand %p377_p2, %p374_p1 }
 0x162   :  { %382 = shalt.err (!%p379_p3)
}
 0x163   :  { %214 = dma.vmem_to_hbm [thread:$0]  %s212_s21, 256, %s466_s3, [#allocation4]  }
 0x164   :  { %387 = dma.done.wait [#allocation4], 256  }
 0x165   :  { %388 = vsyncadd [#allocation4], 4294967040 }
 0x166   :  { %218 = vsyncpa [#allocation3], 1 }
 0x167   :  { %219 = vsyncpa [#allocation6], 1 }
 0x168   :  { %220 = vsyncpa [#allocation4], 1 }

</bundles_post_ra>
